<compile_context>
chip_gen: v5e
topology: v5e:2x2
jax: 0.10.0
libtpu: 0.0.40
codegen_flags: <defaults>
</compile_context>

<pallas_src>
import functools
import math

import jax
import jax.numpy as jnp
from jax.experimental import pallas as pl
from jax.experimental.pallas import tpu as pltpu


_KRON_MAX_S = 2048          # largest S for which the (S, S) fused weight is built


def _default_vmem_limit():
    """Scoped-VMEM limit: ~3/4 of physical VMEM, capped at 48 MiB (v7x has only
    64 MiB per TensorCore; v5e/v6e have 128 MiB but a 16/32 MiB default scoped
    limit that must be raised to use large tiles)."""
    try:
        cap = int(pltpu.get_tpu_info().vmem_capacity_bytes)
    except Exception:
        cap = 64 * 1024 * 1024
    return int(min(cap * 3 // 4, 48 * 1024 * 1024))


_VMEM_LIMIT = _default_vmem_limit()


def _pick_batch_tile(B, S, itemsize, *, budget_bytes, min_grid_steps=2):
    """Rows of the (tb, S) activation tile: as many as the VMEM budget allows
    (x + out tiles, double-buffered by the pipeline), rounded down to an
    MXU-friendly multiple (256 feeds the 256x256 MXU on v6e/v7x, 128/8 for
    smaller caps), and small enough that the batch grid has >= min_grid_steps
    steps so the "parallel" axis can be split across TensorCores on v7x."""
    row_bytes = 4 * S * itemsize                 # 2 arrays (x, out) x 2 pipeline buffers
    tb = max(8, budget_bytes // max(1, row_bytes))
    if min_grid_steps > 1:
        tb = min(tb, max(8, pl.cdiv(B, min_grid_steps)))
    if tb >= B:
        return B                                 # whole batch in one tile
    for m in (256, 128, 8):
        if tb >= m:
            return (tb // m) * m                 # keep the (8, 128) tiling rule
    return tb


# ---------------------------------------------------------------------------
# Primary kernel: fused Kronecker matmul   (B, S) @ (S, S) -> (B, S)
# ---------------------------------------------------------------------------
def _kron_matmul_kernel(x_ref, w_ref, o_ref):
    # x_ref: (tb, S) activations; w_ref: (S, S) fused Kronecker weight (bf16);
    # o_ref: (tb, S).  bf16 MXU matmul with f32 accumulation, lane-dense store.
    o_ref[...] = jnp.dot(
        x_ref[...].astype(jnp.bfloat16),
        w_ref[...],
        preferred_element_type=jnp.float32,
    ).astype(o_ref.dtype)


def kron_matmul(x, w_kron, *, tb=None):
    """(B, S) @ (S, S) -> (B, S) in a single batch-tiled Pallas kernel."""
    B, S = x.shape
    w_bytes = 2 * int(w_kron.size) * w_kron.dtype.itemsize   # double-buffered weight
    if tb is None:
        budget = max(2 << 20, _VMEM_LIMIT - w_bytes - (8 << 20))
        tb = _pick_batch_tile(B, S, x.dtype.itemsize, budget_bytes=budget)
    grid = (pl.cdiv(B, tb),)
    return pl.pallas_call(
        _kron_matmul_kernel,
        out_shape=jax.ShapeDtypeStruct((B, S), x.dtype),
        grid_spec=pltpu.PrefetchScalarGridSpec(
            num_scalar_prefetch=0,
            grid=grid,
            in_specs=[
                pl.BlockSpec((tb, S), lambda i: (i, 0)),   # lane-dense activation tile
                pl.BlockSpec((S, S), lambda i: (0, 0)),    # fused weight; constant block
                                                           # index -> fetched once
            ],
            out_specs=pl.BlockSpec((tb, S), lambda i: (i, 0)),   # lane-dense store
        ),
        compiler_params=pltpu.CompilerParams(
            dimension_semantics=("parallel",),
            vmem_limit_bytes=_VMEM_LIMIT,
        ),
        cost_estimate=pl.CostEstimate(
            flops=2 * B * S * S,
            transcendentals=0,
            bytes_accessed=2 * B * S * x.dtype.itemsize
            + S * S * w_kron.dtype.itemsize,
        ),
    )(x, w_kron)


def build_kron_weight(ws, dtype=jnp.bfloat16):
    """kron(w_n, ..., w_1): matches the x.reshape(B, *reversed(factors)) row-major
    layout.  Built in f32 (exact products) and stored in `dtype` (bf16 by default
    to halve the HBM/VMEM cost of the weight-bandwidth-bound fused kernel).
    Build once and reuse across forward calls."""
    ws = [jnp.asarray(w, jnp.float32) for w in ws]
    return functools.reduce(jnp.kron, ws[::-1]).astype(dtype)


def group_factors(ws, factors, *, min_dim=128, max_dim=1024, dtype=jnp.bfloat16):
    """Fold CONSECUTIVE factors (original order = minor -> major mode) into
    partial-Kronecker groups.  Each grouped weight dim is pushed to >= min_dim
    when possible (lane-dense K = N >= 128, unmasked stores) while staying
    <= max_dim (bounds the grouped weight size / extra FLOPs).
    Returns (grouped_weights, grouped_sizes)."""
    groups, sizes = [], []
    cur, cur_size = [], 1
    for w, f in zip(ws, factors):
        if cur and (cur_size >= min_dim or cur_size * f > max_dim):
            groups.append(cur)
            sizes.append(cur_size)
            cur, cur_size = [], 1
        cur.append(w)
        cur_size *= f
    if cur:
        if groups and cur_size < min_dim and sizes[-1] * cur_size <= max_dim:
            groups[-1].extend(cur)       # merge a short tail into the previous group
            sizes[-1] *= cur_size
        else:
            groups.append(cur)
            sizes.append(cur_size)
    gws = [
        functools.reduce(
            jnp.kron, [jnp.asarray(w, jnp.float32) for w in g][::-1]
        ).astype(dtype)
        for g in groups
    ]
    return gws, sizes


# ---------------------------------------------------------------------------
# Fallback kernel (large S): one batched mode-matmul + movedim per (grouped) factor.
#   x: (B, P, g) @ w: (g, g) -> o: (B, g, P)   ==   (x @ w).movedim(-1, 1) in flat form
# ---------------------------------------------------------------------------
def _mode_matmul_kernel(x_ref, w_ref, o_ref):
    tb, P, g = x_ref.shape
    x2 = x_ref[...].reshape(tb * P, g)          # leading-dim merge only (minor dim kept)
    y2 = jnp.dot(
        x2.astype(jnp.bfloat16), w_ref[...], preferred_element_type=jnp.float32
    )
    o_ref[...] = jnp.swapaxes(y2.reshape(tb, P, g), -1, -2).astype(o_ref.dtype)


def mode_matmul(x, w, *, tb=None):
    B, P, g = x.shape
    S = P * g
    w_bytes = 2 * int(w.size) * w.dtype.itemsize
    if tb is None:
        budget = max(2 << 20, _VMEM_LIMIT - w_bytes - (8 << 20))
        tb = _pick_batch_tile(B, S, x.dtype.itemsize, budget_bytes=budget)
    grid = (pl.cdiv(B, tb),)
    return pl.pallas_call(
        _mode_matmul_kernel,
        out_shape=jax.ShapeDtypeStruct((B, g, P), x.dtype),
        grid_spec=pltpu.PrefetchScalarGridSpec(
            num_scalar_prefetch=0,
            grid=grid,
            in_specs=[
                pl.BlockSpec((tb, P, g), lambda i: (i, 0, 0)),
                pl.BlockSpec((g, g), lambda i: (0, 0)),
            ],
            out_specs=pl.BlockSpec((tb, g, P), lambda i: (i, 0, 0)),
        ),
        compiler_params=pltpu.CompilerParams(
            dimension_semantics=("parallel",),
            vmem_limit_bytes=_VMEM_LIMIT,
        ),
        cost_estimate=pl.CostEstimate(
            flops=2 * B * S * g,
            transcendentals=0,
            bytes_accessed=2 * B * S * x.dtype.itemsize + g * g * w.dtype.itemsize,
        ),
    )(x, w)


# ---------------------------------------------------------------------------
# Forward
# ---------------------------------------------------------------------------
def l1_forward(x, ws, factors, *, w_kron=None, use_kron=None,
               group_min=128, group_max=1024):
    """Pallas implementation of L1.forward."""
    S = math.prod(factors)
    B = x.size // S
    y = x.reshape(B, S)
    if use_kron is None:
        # Fused single-pass kernel whenever the (S, S) weight is practical.
        # (For very large B the chained/grouped path's lower FLOP count can win;
        # callers in that regime can pass use_kron=False.)
        use_kron = S <= _KRON_MAX_S
    if use_kron:
        if w_kron is None:
            w_kron = build_kron_weight(ws)
        y = kron_matmul(y, w_kron)
    else:
        gws, gsizes = group_factors(ws, factors, min_dim=group_min, max_dim=group_max)
        for gw, g in zip(gws, gsizes):           # groups in original (minor->major) order
            P = S // g
            if P == 1:
                # Group spans the whole row: the movedim is a no-op on the flat
                # layout, so this is a plain lane-dense (B, S) @ (S, S) matmul.
                y = kron_matmul(y, gw)
            else:
                y = mode_matmul(y.reshape(B, P, g), gw).reshape(B, S)
    return y.reshape((B,) + tuple(reversed(factors)))


def l1_ref(x, ws, factors):
    """Pure-JAX reference mirroring the PyTorch forward exactly."""
    S = math.prod(factors)
    B = x.size // S
    y = x.reshape((B,) + tuple(reversed(factors)))
    for w in ws:
        y = jnp.moveaxis(y @ w, -1, 1)
    return y


if __name__ == "__main__":
    factors = [4, 8, 16]                  # state_size S = 512
    S = math.prod(factors)
    B = 8

    key = jax.random.PRNGKey(0)
    kx, kw = jax.random.split(key)

    # Deterministic parameter init mirroring the module __init__: a flat W of
    # length sum(f*f), sliced per factor (original order).
    W = jax.random.normal(kw, (sum(f * f for f in factors),), dtype=jnp.float32)
    ws, acc = [], 0
    for f in factors:
        ws.append(W[acc:acc + f * f].reshape(f, f))
        acc += f * f

    x = jax.random.normal(kx, (B, S), dtype=jnp.float32)

    ref = l1_ref(x, ws, factors)
    expect_shape = (B,) + tuple(reversed(factors))
    ref_scale = jnp.max(jnp.abs(ref)) + 1e-6

    # Primary path: precompute the fused bf16 Kronecker weight once, single launch.
    w_kron = jax.block_until_ready(build_kron_weight(ws))
    out = jax.block_until_ready(l1_forward(x, ws, factors, w_kron=w_kron))
    assert out.shape == expect_shape, out.shape
    # bf16 MXU passes + different summation order than the sequential reference.
    rel_err = jnp.max(jnp.abs(out - ref)) / ref_scale
    assert rel_err < 1e-2, f"kron path mismatch vs reference, rel_err={rel_err}"

    # Fallback path with default grouping (here [4,8,16] folds into one 512-wide
    # group, which routes through the same lane-dense matmul kernel).
    out2 = jax.block_until_ready(l1_forward(x, ws, factors, use_kron=False))
    assert out2.shape == expect_shape, out2.shape
    rel_err2 = jnp.max(jnp.abs(out2 - ref)) / ref_scale
    assert rel_err2 < 1e-2, f"grouped chain mismatch vs reference, rel_err={rel_err2}"

    # Fallback path with grouping disabled: exercises the per-mode matmul +
    # movedim kernel chain (the large-S code path's building block).
    out3 = jax.block_until_ready(
        l1_forward(x, ws, factors, use_kron=False, group_min=1)
    )
    assert out3.shape == expect_shape, out3.shape
    rel_err3 = jnp.max(jnp.abs(out3 - ref)) / ref_scale
    assert rel_err3 < 1e-2, f"per-mode chain mismatch vs reference, rel_err={rel_err3}"

    print("KERNEL_OK")
</pallas_src>

<mosaic_0001>
module attributes {stable_mosaic.version = 11 : i64} {
  func.func @_kron_matmul_kernel(%arg0: i32, %arg1: memref<8x512xf32, #tpu.memory_space<vmem>>, %arg2: memref<512x512xbf16, #tpu.memory_space<vmem>>, %arg3: memref<8x512xf32, #tpu.memory_space<vmem>>) attributes {dimension_semantics = [#tpu.dimension_semantics<parallel>], iteration_bounds = array<i64: 1>, scalar_prefetch = 0 : i64, scratch_operands = 0 : i64, tpu.core_type = #tpu.core_type<tc>, window_params = [{transform_indices = @transform_0, window_bounds = array<i64: 8, 512>}, {pipeline_mode = #tpu.pipeline_mode<synchronous>, transform_indices = @transform_1, window_bounds = array<i64: 512, 512>}, {transform_indices = @transform_2, window_bounds = array<i64: 8, 512>}]} {
    %c0 = arith.constant 0 : index
    %c0_0 = arith.constant 0 : index
    %0 = vector.load %arg1[%c0, %c0_0] : memref<8x512xf32, #tpu.memory_space<vmem>>, vector<8x512xf32>
    %1 = arith.truncf %0 : vector<8x512xf32> to vector<8x512xbf16>
    %c0_1 = arith.constant 0 : index
    %c0_2 = arith.constant 0 : index
    %2 = vector.load %arg2[%c0_1, %c0_2] : memref<512x512xbf16, #tpu.memory_space<vmem>>, vector<512x512xbf16>
    %cst = arith.constant dense<0.000000e+00> : vector<8x512xf32>
    %3 = tpu.matmul %1, %2, %cst {dimension_numbers = #tpu.dot_dimension_numbers<[1], [0], [0], [1], [0, 0, 1, 1], [], []>} : vector<8x512xbf16>, vector<512x512xbf16>, vector<8x512xf32> -> vector<8x512xf32>
    %c0_3 = arith.constant 0 : index
    %c0_4 = arith.constant 0 : index
    %4 = vector.load %arg3[%c0_3, %c0_4] : memref<8x512xf32, #tpu.memory_space<vmem>>, vector<8x512xf32>
    tpu.vector_store %arg3[%c0_3, %c0_4], %3 {strides = array<i32>} : memref<8x512xf32, #tpu.memory_space<vmem>>, vector<8x512xf32>,
    return
  }
  func.func @transform_0(%arg0: i32) -> (i32, i32) {
    %c0_i32 = arith.constant 0 : i32
    %c0_i32_0 = arith.constant 0 : i32
    return %arg0, %c0_i32 : i32, i32
  }
  func.func @transform_1(%arg0: i32) -> (i32, i32) {
    %c0_i32 = arith.constant 0 : i32
    %c0_i32_0 = arith.constant 0 : i32
    %c0_i32_1 = arith.constant 0 : i32
    return %c0_i32, %c0_i32_0 : i32, i32
  }
  func.func @transform_2(%arg0: i32) -> (i32, i32) {
    %c0_i32 = arith.constant 0 : i32
    %c0_i32_0 = arith.constant 0 : i32
    return %arg0, %c0_i32 : i32, i32
  }
}

</mosaic_0001>

<bundles_post_ra>
// kernel: tpu_custom_call.1
= control target key start
LH: loop header
LB: loop body
LE: loop exit
PB: predicated region body
PF: predicated region fallthrough
CT: control target
= control target key end

     0   :  { %7 = vsyncpa [#allocation3], 0  ;;  %s1824_s0 = inlined_call_operand.hbm [shape: f32[8,512], index: 0, kind: input, shape index: {}]   ;;  %s1825_s1 = inlined_call_operand.hbm [shape: bf16[512,512], index: 1, kind: input, shape index: {}]   ;;  %s1826_s2 = inlined_call_operand.hbm [shape: f32[8,512], index: 2, kind: output, shape index: {}]  }
   0x1   :  { %8 = vsyncpa [#allocation6], 0 }
   0x2   :  { %9 = vsyncpa [#allocation4], 0  ;;  %s15_s11 = sshll.u32 %s1824_s0, 4  ;;  %s1771_s12 = smov [#allocation2]   ;;  %s16_s11 = int_to_ptr.hbm [resolvable:$true] %s15_s11 }
   0x3   :  { %s17_s13 = sshll.u32 %s1771_s12, 4  ;;  %s25_s16 = sshll.u32 %s1825_s1, 4  ;;  %s18_s13 = int_to_ptr.vmem [resolvable:$true] %s17_s13  ;;  %s26_s16 = int_to_ptr.hbm [resolvable:$true] %s25_s16 }
   0x4   :  { %20 = dma.hbm_to_vmem [thread:$0]  %s16_s11, 512, %s18_s13, [#allocation3]  }
   0x5   :  { %s1772_s17 = smov [#allocation5]   ;;  %s1773_s19 = smov 256  }
   0x6   :  { %s27_s18 = sshll.u32 %s1772_s17, 4  ;;  %s1774_s20 = smov 16   ;;  %s28_s18 = int_to_ptr.vmem [resolvable:$true] %s27_s18 }
   0x7   :  { %33 = dma.hbm_to_vmem [thread:$0]  %s26_s16, 16384, %s28_s18, [#allocation6], %s1773_s19, %s1773_s19, %s1774_s20  }
   0x8   :  { %1765 = dma.done.wait [#allocation3], 512  }
   0x9   :  { %1766 = vsyncadd [#allocation3], 4294966784 }
   0xa   :  { %1767 = dma.done.wait [#allocation6], 16384  }
   0xb   :  { %1768 = vsyncadd [#allocation6], 4294950912  ;;  %v1162_v0 = vld [vmem:[#allocation5 + $0xe0] sm:$0xf]  ;;  %v1590_v1 = vld [vmem:[#allocation5 + $0xec] sm:$0xf0] }
   0xc   :  { %v1290_v2 = vld [vmem:[#allocation5 + $0x1e0] sm:$0xf]  ;;  %v1163_v3 = vor.u32 %v1590_v1, %v1162_v0  ;;  %v1622_v4 = vld [vmem:[#allocation5 + $0x1ec] sm:$0xf0]  ;;  %s1775_s0 = smov [#allocation7]   ;;  %s1037_s23 = sshll.u32 %s1826_s2, 4  ;;  %s1038_s23 = int_to_ptr.hbm [resolvable:$true] %s1037_s23 }
   0xd   :  { %v1418_v5 = vld [vmem:[#allocation5 + $0x2e0] sm:$0xf]  ;;  %v1654_v6 = vld [vmem:[#allocation5 + $0x2ec] sm:$0xf0]  ;;  %v1291_v7 = vor.u32 %v1622_v4, %v1290_v2  ;;  %s1035_s1 = sshll.u32 %s1775_s0, 4  ;;  %s1036_s1 = int_to_ptr.vmem [resolvable:$true] %s1035_s1 }
   0xe   :  { %v1419_v8 = vor.u32 %v1654_v6, %v1418_v5  ;;  %v1546_v9 = vld [vmem:[#allocation5 + $0x3e0] sm:$0xf]  ;;  %v1686_v10 = vld [vmem:[#allocation5 + $0x3ec] sm:$0xf0]  ;;  %818 = vmatpush.bf16.msra.mxu0 %v1163_v3 }
   0xf   :  { %v1146_v11 = vld [vmem:[#allocation5 + $0xc0] sm:$0xf]  ;;  %v1547_v12 = vor.u32 %v1686_v10, %v1546_v9  ;;  %v1586_v13 = vld [vmem:[#allocation5 + $0xcc] sm:$0xf0]  ;;  %831 = vmatpush.bf16.msra.mxu1 %v1291_v7 }
  0x10   :  { %v1274_v14 = vld [vmem:[#allocation5 + $0x1c0] sm:$0xf]  ;;  %v1618_v15 = vld [vmem:[#allocation5 + $0x1cc] sm:$0xf0]  ;;  %844 = vmatpush.bf16.msra.mxu2 %v1419_v8  ;;  %v1147_v16 = vor.u32 %v1586_v13, %v1146_v11 }
  0x11   :  { %v1275_v17 = vor.u32 %v1618_v15, %v1274_v14  ;;  %v1402_v18 = vld [vmem:[#allocation5 + $0x2c0] sm:$0xf]  ;;  %v1650_v19 = vld [vmem:[#allocation5 + $0x2cc] sm:$0xf0]  ;;  %857 = vmatpush.bf16.msra.mxu3 %v1547_v12 }
  0x12   :  { %v1530_v20 = vld [vmem:[#allocation5 + $0x3c0] sm:$0xf]  ;;  %v1403_v21 = vor.u32 %v1650_v19, %v1402_v18  ;;  %v1682_v22 = vld [vmem:[#allocation5 + $0x3cc] sm:$0xf0]  ;;  %819 = vmatpush.bf16.msra.mxu0 %v1147_v16 }
  0x13   :  { %v1130_v23 = vld [vmem:[#allocation5 + $0xa0] sm:$0xf]  ;;  %v1582_v24 = vld [vmem:[#allocation5 + $0xac] sm:$0xf0]  ;;  %v1531_v25 = vor.u32 %v1682_v22, %v1530_v20  ;;  %832 = vmatpush.bf16.msra.mxu1 %v1275_v17 }
  0x14   :  { %v1258_v26 = vld [vmem:[#allocation5 + $0x1a0] sm:$0xf]  ;;  %v1614_v27 = vld [vmem:[#allocation5 + $0x1ac] sm:$0xf0]  ;;  %v1131_v29 = vor.u32 %v1582_v24, %v1130_v23  ;;  %845 = vmatpush.bf16.msra.mxu2 %v1403_v21 }
  0x15   :  { %v1386_v28 = vld [vmem:[#allocation5 + $0x2a0] sm:$0xf]  ;;  %v1646_v30 = vld [vmem:[#allocation5 + $0x2ac] sm:$0xf0]  ;;  %v1259_v33 = vor.u32 %v1614_v27, %v1258_v26  ;;  %858 = vmatpush.bf16.msra.mxu3 %v1531_v25 }
  0x16   :  { %v1514_v31 = vld [vmem:[#allocation5 + $0x3a0] sm:$0xf]  ;;  %v1678_v32 = vld [vmem:[#allocation5 + $0x3ac] sm:$0xf0]  ;;  %v1387_v34 = vor.u32 %v1646_v30, %v1386_v28  ;;  %820 = vmatpush.bf16.msra.mxu0 %v1131_v29  ;;  %v1588_v28 = vld [vmem:[#allocation5 + $0xe4] sm:$0xf] }
  0x17   :  { %v1114_v35 = vld [vmem:[#allocation5 + $0x80] sm:$0xf]  ;;  %v1578_v36 = vld [vmem:[#allocation5 + $0x8c] sm:$0xf0]  ;;  %v1515_v38 = vor.u32 %v1678_v32, %v1514_v31  ;;  %833 = vmatpush.bf16.msra.mxu1 %v1259_v33  ;;  %v1164_v29 = vld [vmem:[#allocation5 + $0xf0] sm:$0xf0] }
  0x18   :  { %v1242_v37 = vld [vmem:[#allocation5 + $0x180] sm:$0xf]  ;;  %v1610_v39 = vld [vmem:[#allocation5 + $0x18c] sm:$0xf0]  ;;  %v1115_v44 = vor.u32 %v1578_v36, %v1114_v35  ;;  %846 = vmatpush.bf16.msra.mxu2 %v1387_v34  ;;  %v1620_v30 = vld [vmem:[#allocation5 + $0x1e4] sm:$0xf] }
  0x19   :  { %v1370_v40 = vld [vmem:[#allocation5 + $0x280] sm:$0xf]  ;;  %v1642_v41 = vld [vmem:[#allocation5 + $0x28c] sm:$0xf0]  ;;  %v1243_v45 = vor.u32 %v1610_v39, %v1242_v37  ;;  %859 = vmatpush.bf16.msra.mxu3 %v1515_v38  ;;  %v1292_v32 = vld [vmem:[#allocation5 + $0x1f0] sm:$0xf0] }
  0x1a   :  { %v1498_v42 = vld [vmem:[#allocation5 + $0x380] sm:$0xf]  ;;  %v1674_v43 = vld [vmem:[#allocation5 + $0x38c] sm:$0xf0]  ;;  %v1371_v46 = vor.u32 %v1642_v41, %v1370_v40  ;;  %821 = vmatpush.bf16.msra.mxu0 %v1115_v44  ;;  %v1652_v33 = vld [vmem:[#allocation5 + $0x2e4] sm:$0xf]  ;;  %v1167_v40 = vor.u32 %v1588_v28, %v1164_v29  ;;  %v1295_v41 = vor.u32 %v1620_v30, %v1292_v32 }
  0x1b   :  { %v1098_v47 = vld [vmem:[#allocation5 + $0x60] sm:$0xf]  ;;  %v1574_v48 = vld [vmem:[#allocation5 + $0x6c] sm:$0xf0]  ;;  %v1499_v50 = vor.u32 %v1674_v43, %v1498_v42  ;;  %834 = vmatpush.bf16.msra.mxu1 %v1243_v45  ;;  %v1420_v34 = vld [vmem:[#allocation5 + $0x2f0] sm:$0xf0] }
  0x1c   :  { %v1226_v49 = vld [vmem:[#allocation5 + $0x160] sm:$0xf]  ;;  %v1606_v51 = vld [vmem:[#allocation5 + $0x16c] sm:$0xf0]  ;;  %v1099_v56 = vor.u32 %v1574_v48, %v1098_v47  ;;  %847 = vmatpush.bf16.msra.mxu2 %v1371_v46  ;;  %v1684_v37 = vld [vmem:[#allocation5 + $0x3e4] sm:$0xf]  ;;  %v1423_v42 = vor.u32 %v1652_v33, %v1420_v34 }
  0x1d   :  { %v1354_v52 = vld [vmem:[#allocation5 + $0x260] sm:$0xf]  ;;  %v1638_v53 = vld [vmem:[#allocation5 + $0x26c] sm:$0xf0]  ;;  %v1227_v57 = vor.u32 %v1606_v51, %v1226_v49  ;;  %860 = vmatpush.bf16.msra.mxu3 %v1499_v50  ;;  %v1548_v38 = vld [vmem:[#allocation5 + $0x3f0] sm:$0xf0] }
  0x1e   :  { %v1482_v54 = vld [vmem:[#allocation5 + $0x360] sm:$0xf]  ;;  %v1670_v55 = vld [vmem:[#allocation5 + $0x36c] sm:$0xf0]  ;;  %v1355_v58 = vor.u32 %v1638_v53, %v1354_v52  ;;  %822 = vmatpush.bf16.msra.mxu0 %v1099_v56  ;;  %v1584_v43 = vld [vmem:[#allocation5 + $0xc4] sm:$0xf]  ;;  %v1551_v46 = vor.u32 %v1684_v37, %v1548_v38 }
  0x1f   :  { %v1082_v59 = vld [vmem:[#allocation5 + $0x40] sm:$0xf]  ;;  %v1570_v60 = vld [vmem:[#allocation5 + $0x4c] sm:$0xf0]  ;;  %v1483_v62 = vor.u32 %v1670_v55, %v1482_v54  ;;  %835 = vmatpush.bf16.msra.mxu1 %v1227_v57  ;;  %v1148_v44 = vld [vmem:[#allocation5 + $0xd0] sm:$0xf0] }
  0x20   :  { %v1210_v61 = vld [vmem:[#allocation5 + $0x140] sm:$0xf]  ;;  %v1602_v63 = vld [vmem:[#allocation5 + $0x14c] sm:$0xf0]  ;;  %v1083_v4 = vor.u32 %v1570_v60, %v1082_v59  ;;  %848 = vmatpush.bf16.msra.mxu2 %v1355_v58  ;;  %v1616_v45 = vld [vmem:[#allocation5 + $0x1c4] sm:$0xf]  ;;  %v1151_v52 = vor.u32 %v1584_v43, %v1148_v44 }
  0x21   :  { %v1338_v0 = vld [vmem:[#allocation5 + $0x240] sm:$0xf]  ;;  %v1634_v1 = vld [vmem:[#allocation5 + $0x24c] sm:$0xf0]  ;;  %v1211_v5 = vor.u32 %v1602_v63, %v1210_v61  ;;  %861 = vmatpush.bf16.msra.mxu3 %v1483_v62  ;;  %v1276_v47 = vld [vmem:[#allocation5 + $0x1d0] sm:$0xf0] }
  0x22   :  { %v1466_v2 = vld [vmem:[#allocation5 + $0x340] sm:$0xf]  ;;  %v1666_v3 = vld [vmem:[#allocation5 + $0x34c] sm:$0xf0]  ;;  %v1339_v6 = vor.u32 %v1634_v1, %v1338_v0  ;;  %823 = vmatpush.bf16.msra.mxu0 %v1083_v4  ;;  %v1648_v48 = vld [vmem:[#allocation5 + $0x2c4] sm:$0xf]  ;;  %v1279_v54 = vor.u32 %v1616_v45, %v1276_v47 }
  0x23   :  { %v1066_v7 = vld [vmem:[#allocation5 + $0x20] sm:$0xf]  ;;  %v1566_v8 = vld [vmem:[#allocation5 + $0x2c] sm:$0xf0]  ;;  %v1467_v10 = vor.u32 %v1666_v3, %v1466_v2  ;;  %836 = vmatpush.bf16.msra.mxu1 %v1211_v5  ;;  %v1404_v49 = vld [vmem:[#allocation5 + $0x2d0] sm:$0xf0] }
  0x24   :  { %v1194_v9 = vld [vmem:[#allocation5 + $0x120] sm:$0xf]  ;;  %v1598_v11 = vld [vmem:[#allocation5 + $0x12c] sm:$0xf0]  ;;  %v1067_v16 = vor.u32 %v1566_v8, %v1066_v7  ;;  %849 = vmatpush.bf16.msra.mxu2 %v1339_v6  ;;  %v1680_v50 = vld [vmem:[#allocation5 + $0x3c4] sm:$0xf]  ;;  %v1407_v55 = vor.u32 %v1648_v48, %v1404_v49 }
  0x25   :  { %v1322_v12 = vld [vmem:[#allocation5 + $0x220] sm:$0xf]  ;;  %v1630_v13 = vld [vmem:[#allocation5 + $0x22c] sm:$0xf0]  ;;  %v1195_v19 = vor.u32 %v1598_v11, %v1194_v9  ;;  %862 = vmatpush.bf16.msra.mxu3 %v1467_v10  ;;  %v1532_v51 = vld [vmem:[#allocation5 + $0x3d0] sm:$0xf0] }
  0x26   :  { %v1450_v14 = vld [vmem:[#allocation5 + $0x320] sm:$0xf]  ;;  %v1662_v15 = vld [vmem:[#allocation5 + $0x32c] sm:$0xf0]  ;;  %v1323_v20 = vor.u32 %v1630_v13, %v1322_v12  ;;  %824 = vmatpush.bf16.msra.mxu0 %v1067_v16  ;;  %v1580_v53 = vld [vmem:[#allocation5 + $0xa4] sm:$0xf]  ;;  %v1535_v59 = vor.u32 %v1680_v50, %v1532_v51 }
  0x27   :  { %v1050_v17 = vld [vmem:[#allocation5] sm:$0xf]  ;;  %v1562_v18 = vld [vmem:[#allocation5 + $0xc] sm:$0xf0]  ;;  %v1451_v24 = vor.u32 %v1662_v15, %v1450_v14  ;;  %837 = vmatpush.bf16.msra.mxu1 %v1195_v19  ;;  %v1132_v56 = vld [vmem:[#allocation5 + $0xb0] sm:$0xf0] }
  0x28   :  { %v1178_v21 = vld [vmem:[#allocation5 + $0x100] sm:$0xf]  ;;  %v1594_v22 = vld [vmem:[#allocation5 + $0x10c] sm:$0xf0]  ;;  %v1051_v31 = vor.u32 %v1562_v18, %v1050_v17  ;;  %850 = vmatpush.bf16.msra.mxu2 %v1323_v20  ;;  %v1612_v57 = vld [vmem:[#allocation5 + $0x1a4] sm:$0xf]  ;;  %v1135_v0 = vor.u32 %v1580_v53, %v1132_v56 }
  0x29   :  { %v1306_v23 = vld [vmem:[#allocation5 + $0x200] sm:$0xf]  ;;  %v1626_v25 = vld [vmem:[#allocation5 + $0x20c] sm:$0xf0]  ;;  %v1179_v35 = vor.u32 %v1594_v22, %v1178_v21  ;;  %863 = vmatpush.bf16.msra.mxu3 %v1451_v24  ;;  %v1260_v58 = vld [vmem:[#allocation5 + $0x1b0] sm:$0xf0] }
  0x2a   :  { %v1434_v26 = vld [vmem:[#allocation5 + $0x300] sm:$0xf]  ;;  %v1658_v27 = vld [vmem:[#allocation5 + $0x30c] sm:$0xf0]  ;;  %v1307_v36 = vor.u32 %v1626_v25, %v1306_v23  ;;  %825 = vmatpush.bf16.msra.mxu0 %v1051_v31  ;;  %v1644_v60 = vld [vmem:[#allocation5 + $0x2a4] sm:$0xf]  ;;  %v1263_v1 = vor.u32 %v1612_v57, %v1260_v58 }
  0x2b   :  { %v1435_v39 = vor.u32 %v1658_v27, %v1434_v26  ;;  %838 = vmatpush.bf16.msra.mxu1 %v1179_v35  ;;  %v1388_v61 = vld [vmem:[#allocation5 + $0x2b0] sm:$0xf0]  ;;  %v1676_v62 = vld [vmem:[#allocation5 + $0x3a4] sm:$0xf]  ;;  %v45_v3 = vld [vmem:[#allocation2 + $0x18] sm:$0xff] }
  0x2c   :  { %851 = vmatpush.bf16.msra.mxu2 %v1307_v36  ;;  %v1516_v63 = vld [vmem:[#allocation5 + $0x3b0] sm:$0xf0]  ;;  %v1391_v4 = vor.u32 %v1644_v60, %v1388_v61  ;;  %v1576_v5 = vld [vmem:[#allocation5 + $0x84] sm:$0xf]  ;;  %v1799_v9 = vpack.c.bf16 %v45_v3, %v45_v3  ;;  %v43_v19 = vld [vmem:[#allocation2 + $0x8] sm:$0xff] }
  0x2d   :  { %864 = vmatpush.bf16.msra.mxu3 %v1435_v39  ;;  %v44_v2 = vld [vmem:[#allocation2 + $0x10] sm:$0xff]  ;;  %v1608_v7 = vld [vmem:[#allocation5 + $0x184] sm:$0xf]  ;;  %v1519_v10 = vor.u32 %v1676_v62, %v1516_v63  ;;  %v1805_v25 = vpack.c.bf16 %v43_v19, %v43_v19 }
  0x2e   :  { %870 = vmatpush.bf16.msrb.mxu0 %v1167_v40  ;;  %v1116_v6 = vld [vmem:[#allocation5 + $0x90] sm:$0xf0]  ;;  %v1797_v8 = vpack.c.bf16 %v44_v2, %v44_v2  ;;  %v1640_v12 = vld [vmem:[#allocation5 + $0x284] sm:$0xf] }
  0x2f   :  { %883 = vmatpush.bf16.msrb.mxu1 %v1295_v41  ;;  %v1244_v11 = vld [vmem:[#allocation5 + $0x190] sm:$0xf0]  ;;  %v1672_v14 = vld [vmem:[#allocation5 + $0x384] sm:$0xf]  ;;  %v1119_v17 = vor.u32 %v1576_v5, %v1116_v6  ;;  %v1591_v5 = vld [vmem:[#allocation5 + $0xf4] sm:$0xf0] }
  0x30   :  { %896 = vmatpush.bf16.msrb.mxu2 %v1423_v42  ;;  %v1372_v13 = vld [vmem:[#allocation5 + $0x290] sm:$0xf0]  ;;  %865 = vmatmul.bf16.vlgmr.msra.gmra.mxu3 %v1799_v9  ;;  %v42_v16 = vld [vmem:[#allocation2] sm:$0xff]  ;;  %v1247_v20 = vor.u32 %v1608_v7, %v1244_v11  ;;  %v1298_v6 = vld [vmem:[#allocation5 + $0x1e8] sm:$0xf] }
  0x31   :  { %909 = vmatpush.bf16.msrb.mxu3 %v1551_v46  ;;  %v1500_v15 = vld [vmem:[#allocation5 + $0x390] sm:$0xf0]  ;;  %852 = vmatmul.bf16.vlgmr.msra.gmra.mxu2 %v1797_v8  ;;  %v1803_v18 = vpack.c.bf16 %v42_v16, %v42_v16  ;;  %v1375_v21 = vor.u32 %v1640_v12, %v1372_v13  ;;  %v1572_v22 = vld [vmem:[#allocation5 + $0x64] sm:$0xf]  ;;  %v1426_v11 = vld [vmem:[#allocation5 + $0x2e8] sm:$0xf] }
  0x32   :  { %871 = vmatpush.bf16.msrb.mxu0 %v1151_v52  ;;  %v1100_v23 = vld [vmem:[#allocation5 + $0x70] sm:$0xf0]  ;;  %v1604_v24 = vld [vmem:[#allocation5 + $0x164] sm:$0xf]  ;;  %v1503_v26 = vor.u32 %v1672_v14, %v1500_v15  ;;  %839 = vmatmul.bf16.vlgmr.msra.gmra.mxu1 %v1805_v25  ;;  %v1655_v12 = vld [vmem:[#allocation5 + $0x2f4] sm:$0xf0] }
  0x33   :  { %884 = vmatpush.bf16.msrb.mxu1 %v1279_v54  ;;  %v1228_v27 = vld [vmem:[#allocation5 + $0x170] sm:$0xf0]  ;;  %v1636_v28 = vld [vmem:[#allocation5 + $0x264] sm:$0xf]  ;;  %826 = vmatmul.bf16.vlgmr.msra.gmra.mxu0 %v1803_v18  ;;  %v1103_v32 = vor.u32 %v1572_v22, %v1100_v23  ;;  %v1554_v15 = vld [vmem:[#allocation5 + $0x3e8] sm:$0xf] }
  0x34   :  { %897 = vmatpush.bf16.msrb.mxu2 %v1407_v55  ;;  %v1356_v29 = vld [vmem:[#allocation5 + $0x270] sm:$0xf0]  ;;  %v1668_v30 = vld [vmem:[#allocation5 + $0x364] sm:$0xf]  ;;  %v1231_v33 = vor.u32 %v1604_v24, %v1228_v27  ;;  %v1687_v16 = vld [vmem:[#allocation5 + $0x3f4] sm:$0xf0] }
  0x35   :  { %910 = vmatpush.bf16.msrb.mxu3 %v1535_v59  ;;  %v1484_v31 = vld [vmem:[#allocation5 + $0x370] sm:$0xf0]  ;;  %v1359_v34 = vor.u32 %v1636_v28, %v1356_v29  ;;  %v1568_v35 = vld [vmem:[#allocation5 + $0x44] sm:$0xf]  ;;  %v1154_v22 = vld [vmem:[#allocation5 + $0xc8] sm:$0xf] }
  0x36   :  { %872 = vmatpush.bf16.msrb.mxu0 %v1135_v0  ;;  %v1084_v36 = vld [vmem:[#allocation5 + $0x50] sm:$0xf0]  ;;  %v1600_v37 = vld [vmem:[#allocation5 + $0x144] sm:$0xf]  ;;  %v1487_v38 = vor.u32 %v1668_v30, %v1484_v31  ;;  %v1587_v23 = vld [vmem:[#allocation5 + $0xd4] sm:$0xf0] }
  0x37   :  { %885 = vmatpush.bf16.msrb.mxu1 %v1263_v1  ;;  %v1212_v39 = vld [vmem:[#allocation5 + $0x150] sm:$0xf0]  ;;  %v1632_v40 = vld [vmem:[#allocation5 + $0x244] sm:$0xf]  ;;  %v1087_v44 = vor.u32 %v1568_v35, %v1084_v36  ;;  %v1282_v24 = vld [vmem:[#allocation5 + $0x1c8] sm:$0xf] }
  0x38   :  { %898 = vmatpush.bf16.msrb.mxu2 %v1391_v4  ;;  %v1340_v41 = vld [vmem:[#allocation5 + $0x250] sm:$0xf0]  ;;  %v1664_v42 = vld [vmem:[#allocation5 + $0x344] sm:$0xf]  ;;  %v1215_v45 = vor.u32 %v1600_v37, %v1212_v39  ;;  %v1170_v4 = vld [vmem:[#allocation5 + $0xe8] sm:$0xf] }
  0x39   :  { %911 = vmatpush.bf16.msrb.mxu3 %v1519_v10  ;;  %v1468_v43 = vld [vmem:[#allocation5 + $0x350] sm:$0xf0]  ;;  %v1343_v46 = vor.u32 %v1632_v40, %v1340_v41  ;;  %v1564_v47 = vld [vmem:[#allocation5 + $0x24] sm:$0xf]  ;;  %v1623_v10 = vld [vmem:[#allocation5 + $0x1f4] sm:$0xf0]  ;;  %v1171_v19 = vor.u32 %v1591_v5, %v1170_v4 }
  0x3a   :  { %873 = vmatpush.bf16.msrb.mxu0 %v1119_v17  ;;  %v1068_v48 = vld [vmem:[#allocation5 + $0x30] sm:$0xf0]  ;;  %v1596_v49 = vld [vmem:[#allocation5 + $0x124] sm:$0xf]  ;;  %v1471_v50 = vor.u32 %v1664_v42, %v1468_v43  ;;  %v1619_v27 = vld [vmem:[#allocation5 + $0x1d4] sm:$0xf0] }
  0x3b   :  { %886 = vmatpush.bf16.msrb.mxu1 %v1247_v20  ;;  %v1196_v51 = vld [vmem:[#allocation5 + $0x130] sm:$0xf0]  ;;  %v1628_v52 = vld [vmem:[#allocation5 + $0x224] sm:$0xf]  ;;  %v1071_v56 = vor.u32 %v1564_v47, %v1068_v48  ;;  %v1299_v20 = vor.u32 %v1623_v10, %v1298_v6  ;;  %v1410_v28 = vld [vmem:[#allocation5 + $0x2c8] sm:$0xf] }
  0x3c   :  { %899 = vmatpush.bf16.msrb.mxu2 %v1375_v21  ;;  %v1324_v53 = vld [vmem:[#allocation5 + $0x230] sm:$0xf0]  ;;  %v1660_v54 = vld [vmem:[#allocation5 + $0x324] sm:$0xf]  ;;  %v1199_v59 = vor.u32 %v1596_v49, %v1196_v51  ;;  %v1427_v21 = vor.u32 %v1655_v12, %v1426_v11  ;;  %v1651_v29 = vld [vmem:[#allocation5 + $0x2d4] sm:$0xf0] }
  0x3d   :  { %912 = vmatpush.bf16.msrb.mxu3 %v1503_v26  ;;  %v1452_v55 = vld [vmem:[#allocation5 + $0x330] sm:$0xf0]  ;;  %v1560_v57 = vld [vmem:[#allocation5 + $0x4] sm:$0xf]  ;;  %v1327_v60 = vor.u32 %v1628_v52, %v1324_v53  ;;  %v1555_v26 = vor.u32 %v1687_v16, %v1554_v15  ;;  %v1538_v30 = vld [vmem:[#allocation5 + $0x3c8] sm:$0xf] }
  0x3e   :  { %874 = vmatpush.bf16.msrb.mxu0 %v1103_v32  ;;  %v1052_v58 = vld [vmem:[#allocation5 + $0x10] sm:$0xf0]  ;;  %v1592_v61 = vld [vmem:[#allocation5 + $0x104] sm:$0xf]  ;;  %v1455_v0 = vor.u32 %v1660_v54, %v1452_v55  ;;  %v1683_v31 = vld [vmem:[#allocation5 + $0x3d4] sm:$0xf0]  ;;  %v1155_v32 = vor.u32 %v1587_v23, %v1154_v22 }
  0x3f   :  { %887 = vmatpush.bf16.msrb.mxu1 %v1231_v33  ;;  %v1180_v62 = vld [vmem:[#allocation5 + $0x110] sm:$0xf0]  ;;  %v1624_v63 = vld [vmem:[#allocation5 + $0x204] sm:$0xf]  ;;  %v1055_v7 = vor.u32 %v1560_v57, %v1052_v58  ;;  %v1283_v33 = vor.u32 %v1619_v27, %v1282_v24  ;;  %v1138_v35 = vld [vmem:[#allocation5 + $0xa8] sm:$0xf] }
  0x40   :  { %900 = vmatpush.bf16.msrb.mxu2 %v1359_v34  ;;  %v1308_v1 = vld [vmem:[#allocation5 + $0x210] sm:$0xf0]  ;;  %v1656_v2 = vld [vmem:[#allocation5 + $0x304] sm:$0xf]  ;;  %v1183_v13 = vor.u32 %v1592_v61, %v1180_v62  ;;  %v1411_v34 = vor.u32 %v1651_v29, %v1410_v28  ;;  %v1583_v36 = vld [vmem:[#allocation5 + $0xb4] sm:$0xf0] }
  0x41   :  { %913 = vmatpush.bf16.msrb.mxu3 %v1487_v38  ;;  %v1436_v3 = vld [vmem:[#allocation5 + $0x310] sm:$0xf0]  ;;  %v1311_v14 = vor.u32 %v1624_v63, %v1308_v1  ;;  %v1266_v37 = vld [vmem:[#allocation5 + $0x1a8] sm:$0xf]  ;;  %v1539_v38 = vor.u32 %v1683_v31, %v1538_v30  ;;  %v1615_v39 = vld [vmem:[#allocation5 + $0x1b4] sm:$0xf0] }
  0x42   :  { %875 = vmatpush.bf16.msrb.mxu0 %v1087_v44  ;;  %v1439_v17 = vor.u32 %v1656_v2, %v1436_v3  ;;  %v1394_v40 = vld [vmem:[#allocation5 + $0x2a8] sm:$0xf]  ;;  %v1647_v41 = vld [vmem:[#allocation5 + $0x2b4] sm:$0xf0]  ;;  %v1139_v44 = vor.u32 %v1583_v36, %v1138_v35 }
  0x43   :  { %888 = vmatpush.bf16.msrb.mxu1 %v1215_v45  ;;  %v1522_v42 = vld [vmem:[#allocation5 + $0x3a8] sm:$0xf]  ;;  %v1679_v43 = vld [vmem:[#allocation5 + $0x3b4] sm:$0xf0]  ;;  %v1267_v45 = vor.u32 %v1615_v39, %v1266_v37 }
  0x44   :  { %901 = vmatpush.bf16.msrb.mxu2 %v1343_v46  ;;  %v1395_v46 = vor.u32 %v1647_v41, %v1394_v40  ;;  %v1122_v47 = vld [vmem:[#allocation5 + $0x88] sm:$0xf]  ;;  %v1579_v48 = vld [vmem:[#allocation5 + $0x94] sm:$0xf0] }
  0x45   :  { %914 = vmatpush.bf16.msrb.mxu3 %v1471_v50  ;;  %v1250_v49 = vld [vmem:[#allocation5 + $0x188] sm:$0xf]  ;;  %v1523_v50 = vor.u32 %v1679_v43, %v1522_v42  ;;  %v1611_v51 = vld [vmem:[#allocation5 + $0x194] sm:$0xf0] }
  0x46   :  { %876 = vmatpush.bf16.msrb.mxu0 %v1071_v56  ;;  %v1378_v52 = vld [vmem:[#allocation5 + $0x288] sm:$0xf]  ;;  %v1643_v53 = vld [vmem:[#allocation5 + $0x294] sm:$0xf0]  ;;  %v1123_v56 = vor.u32 %v1579_v48, %v1122_v47  ;;  %v1251_v57 = vor.u32 %v1611_v51, %v1250_v49  ;;  %v1300_v48 = vld [vmem:[#allocation5 + $0x1f8] sm:$0xf0] }
  0x47   :  { %889 = vmatpush.bf16.msrb.mxu1 %v1199_v59  ;;  %v1506_v54 = vld [vmem:[#allocation5 + $0x388] sm:$0xf]  ;;  %v1675_v55 = vld [vmem:[#allocation5 + $0x394] sm:$0xf0]  ;;  %v1379_v58 = vor.u32 %v1643_v53, %v1378_v52  ;;  %v1653_v49 = vld [vmem:[#allocation5 + $0x2ec] sm:$0xf] }
  0x48   :  { %902 = vmatpush.bf16.msrb.mxu2 %v1327_v60  ;;  %v1106_v59 = vld [vmem:[#allocation5 + $0x68] sm:$0xf]  ;;  %v1575_v60 = vld [vmem:[#allocation5 + $0x74] sm:$0xf0]  ;;  %v1507_v62 = vor.u32 %v1675_v55, %v1506_v54  ;;  %v1685_v53 = vld [vmem:[#allocation5 + $0x3ec] sm:$0xf] }
  0x49   :  { %915 = vmatpush.bf16.msrb.mxu3 %v1455_v0  ;;  %v1234_v61 = vld [vmem:[#allocation5 + $0x168] sm:$0xf]  ;;  %v1607_v63 = vld [vmem:[#allocation5 + $0x174] sm:$0xf0]  ;;  %v1107_v4 = vor.u32 %v1575_v60, %v1106_v59  ;;  %v1556_v54 = vld [vmem:[#allocation5 + $0x3f8] sm:$0xf0] }
  0x4a   :  { %877 = vmatpush.bf16.msrb.mxu0 %v1055_v7  ;;  %v1362_v0 = vld [vmem:[#allocation5 + $0x268] sm:$0xf]  ;;  %v1639_v1 = vld [vmem:[#allocation5 + $0x274] sm:$0xf0]  ;;  %v1235_v5 = vor.u32 %v1607_v63, %v1234_v61  ;;  %v1585_v59 = vld [vmem:[#allocation5 + $0xcc] sm:$0xf] }
  0x4b   :  { %890 = vmatpush.bf16.msrb.mxu1 %v1183_v13  ;;  %v1490_v2 = vld [vmem:[#allocation5 + $0x368] sm:$0xf]  ;;  %v1671_v3 = vld [vmem:[#allocation5 + $0x374] sm:$0xf0]  ;;  %v1363_v6 = vor.u32 %v1639_v1, %v1362_v0  ;;  %v1156_v60 = vld [vmem:[#allocation5 + $0xd8] sm:$0xf0] }
  0x4c   :  { %903 = vmatpush.bf16.msrb.mxu2 %v1311_v14  ;;  %v1090_v7 = vld [vmem:[#allocation5 + $0x48] sm:$0xf]  ;;  %v1571_v10 = vld [vmem:[#allocation5 + $0x54] sm:$0xf0]  ;;  %v1491_v12 = vor.u32 %v1671_v3, %v1490_v2  ;;  %v1617_v61 = vld [vmem:[#allocation5 + $0x1cc] sm:$0xf] }
  0x4d   :  { %916 = vmatpush.bf16.msrb.mxu3 %v1439_v17  ;;  %878 = vmatmul.bf16.vlgmr.msrb.gmra.mxu0 %v1803_v18  ;;  %v1218_v11 = vld [vmem:[#allocation5 + $0x148] sm:$0xf]  ;;  %v1603_v13 = vld [vmem:[#allocation5 + $0x154] sm:$0xf0]  ;;  %v1284_v63 = vld [vmem:[#allocation5 + $0x1d8] sm:$0xf0] }
  0x4e   :  { %922 = vmatpush.bf16.msra.mxu0 %v1171_v19  ;;  %891 = vmatmul.bf16.vlgmr.msrb.gmra.mxu1 %v1805_v25  ;;  %v1346_v14 = vld [vmem:[#allocation5 + $0x248] sm:$0xf]  ;;  %v1635_v15 = vld [vmem:[#allocation5 + $0x254] sm:$0xf0]  ;;  %v1091_v19 = vor.u32 %v1571_v10, %v1090_v7  ;;  %v1649_v0 = vld [vmem:[#allocation5 + $0x2cc] sm:$0xf] }
  0x4f   :  { %935 = vmatpush.bf16.msra.mxu1 %v1299_v20  ;;  %904 = vmatmul.bf16.vlgmr.msrb.gmra.mxu2 %v1797_v8  ;;  %v1474_v16 = vld [vmem:[#allocation5 + $0x348] sm:$0xf]  ;;  %v1667_v17 = vld [vmem:[#allocation5 + $0x354] sm:$0xf0]  ;;  %v1219_v20 = vor.u32 %v1603_v13, %v1218_v11  ;;  %v1412_v1 = vld [vmem:[#allocation5 + $0x2d8] sm:$0xf0] }
  0x50   :  { %948 = vmatpush.bf16.msra.mxu2 %v1427_v21  ;;  %917 = vmatmul.bf16.vlgmr.msrb.gmra.mxu3 %v1799_v9  ;;  %v1347_v21 = vor.u32 %v1635_v15, %v1346_v14  ;;  %v1074_v22 = vld [vmem:[#allocation5 + $0x28] sm:$0xf]  ;;  %v1567_v23 = vld [vmem:[#allocation5 + $0x34] sm:$0xf0]  ;;  %v1681_v2 = vld [vmem:[#allocation5 + $0x3cc] sm:$0xf] }
  0x51   :  { %961 = vmatpush.bf16.msra.mxu3 %v1555_v26  ;;  %v1202_v24 = vld [vmem:[#allocation5 + $0x128] sm:$0xf]  ;;  %v1475_v26 = vor.u32 %v1667_v17, %v1474_v16  ;;  %v1599_v27 = vld [vmem:[#allocation5 + $0x134] sm:$0xf0]  ;;  %v1540_v3 = vld [vmem:[#allocation5 + $0x3d8] sm:$0xf0] }
  0x52   :  { %923 = vmatpush.bf16.msra.mxu0 %v1155_v32  ;;  %v1330_v28 = vld [vmem:[#allocation5 + $0x228] sm:$0xf]  ;;  %v1631_v29 = vld [vmem:[#allocation5 + $0x234] sm:$0xf0]  ;;  %v1075_v32 = vor.u32 %v1567_v23, %v1074_v22  ;;  %v1203_v35 = vor.u32 %v1599_v27, %v1202_v24  ;;  %v1581_v7 = vld [vmem:[#allocation5 + $0xac] sm:$0xf] }
  0x53   :  { %936 = vmatpush.bf16.msra.mxu1 %v1283_v33  ;;  %v1458_v30 = vld [vmem:[#allocation5 + $0x328] sm:$0xf]  ;;  %v1663_v31 = vld [vmem:[#allocation5 + $0x334] sm:$0xf0]  ;;  %v1331_v36 = vor.u32 %v1631_v29, %v1330_v28  ;;  %v1140_v10 = vld [vmem:[#allocation5 + $0xb8] sm:$0xf0] }
  0x54   :  { %949 = vmatpush.bf16.msra.mxu2 %v1411_v34  ;;  %v1058_v33 = vld [vmem:[#allocation5 + $0x8] sm:$0xf]  ;;  %v1563_v34 = vld [vmem:[#allocation5 + $0x14] sm:$0xf0]  ;;  %v1459_v40 = vor.u32 %v1663_v31, %v1458_v30  ;;  %v1613_v11 = vld [vmem:[#allocation5 + $0x1ac] sm:$0xf] }
  0x55   :  { %962 = vmatpush.bf16.msra.mxu3 %v1539_v38  ;;  %v1186_v37 = vld [vmem:[#allocation5 + $0x108] sm:$0xf]  ;;  %v1595_v38 = vld [vmem:[#allocation5 + $0x114] sm:$0xf0]  ;;  %v1059_v47 = vor.u32 %v1563_v34, %v1058_v33  ;;  %v1268_v13 = vld [vmem:[#allocation5 + $0x1b8] sm:$0xf0] }
  0x56   :  { %924 = vmatpush.bf16.msra.mxu0 %v1139_v44  ;;  %v1314_v39 = vld [vmem:[#allocation5 + $0x208] sm:$0xf]  ;;  %v1627_v41 = vld [vmem:[#allocation5 + $0x214] sm:$0xf0]  ;;  %v1589_v44 = vld [vmem:[#allocation5 + $0xec] sm:$0xf]  ;;  %v1187_v51 = vor.u32 %v1595_v38, %v1186_v37 }
  0x57   :  { %937 = vmatpush.bf16.msra.mxu1 %v1267_v45  ;;  %v1442_v42 = vld [vmem:[#allocation5 + $0x308] sm:$0xf]  ;;  %v1659_v43 = vld [vmem:[#allocation5 + $0x314] sm:$0xf0]  ;;  %v1172_v45 = vld [vmem:[#allocation5 + $0xf8] sm:$0xf0]  ;;  %v1315_v52 = vor.u32 %v1627_v41, %v1314_v39 }
  0x58   :  { %950 = vmatpush.bf16.msra.mxu2 %v1395_v46  ;;  %v1621_v46 = vld [vmem:[#allocation5 + $0x1ec] sm:$0xf]  ;;  %v1443_v55 = vor.u32 %v1659_v43, %v1442_v42  ;;  %v1396_v15 = vld [vmem:[#allocation5 + $0x2b8] sm:$0xf0] }
  0x59   :  { %963 = vmatpush.bf16.msra.mxu3 %v1523_v50  ;;  %v1428_v50 = vld [vmem:[#allocation5 + $0x2f8] sm:$0xf0]  ;;  %v1645_v14 = vld [vmem:[#allocation5 + $0x2ac] sm:$0xf] }
  0x5a   :  { %925 = vmatpush.bf16.msra.mxu0 %v1123_v56  ;;  %v1175_v56 = vor.u32 %v1589_v44, %v1172_v45  ;;  %v1677_v16 = vld [vmem:[#allocation5 + $0x3ac] sm:$0xf]  ;;  %v1524_v17 = vld [vmem:[#allocation5 + $0x3b8] sm:$0xf0] }
  0x5b   :  { %938 = vmatpush.bf16.msra.mxu1 %v1251_v57  ;;  %v1303_v57 = vor.u32 %v1621_v46, %v1300_v48  ;;  %v1577_v22 = vld [vmem:[#allocation5 + $0x8c] sm:$0xf]  ;;  %v1124_v23 = vld [vmem:[#allocation5 + $0x98] sm:$0xf0] }
  0x5c   :  { %951 = vmatpush.bf16.msra.mxu2 %v1379_v58  ;;  %v1431_v58 = vor.u32 %v1653_v49, %v1428_v50  ;;  %v1609_v24 = vld [vmem:[#allocation5 + $0x18c] sm:$0xf]  ;;  %v1252_v27 = vld [vmem:[#allocation5 + $0x198] sm:$0xf0] }
  0x5d   :  { %964 = vmatpush.bf16.msra.mxu3 %v1507_v62  ;;  %v1559_v62 = vor.u32 %v1685_v53, %v1556_v54  ;;  %v1641_v28 = vld [vmem:[#allocation5 + $0x28c] sm:$0xf]  ;;  %v1380_v29 = vld [vmem:[#allocation5 + $0x298] sm:$0xf0]  ;;  %v1255_v33 = vor.u32 %v1609_v24, %v1252_v27 }
  0x5e   :  { %926 = vmatpush.bf16.msra.mxu0 %v1107_v4  ;;  %v1159_v4 = vor.u32 %v1585_v59, %v1156_v60  ;;  %v1673_v30 = vld [vmem:[#allocation5 + $0x38c] sm:$0xf]  ;;  %v1508_v31 = vld [vmem:[#allocation5 + $0x398] sm:$0xf0]  ;;  %v1383_v34 = vor.u32 %v1641_v28, %v1380_v29 }
  0x5f   :  { %939 = vmatpush.bf16.msra.mxu1 %v1235_v5  ;;  %v1287_v5 = vor.u32 %v1617_v61, %v1284_v63  ;;  %v1605_v37 = vld [vmem:[#allocation5 + $0x16c] sm:$0xf]  ;;  %v1511_v38 = vor.u32 %v1673_v30, %v1508_v31  ;;  %v1236_v39 = vld [vmem:[#allocation5 + $0x178] sm:$0xf0] }
  0x60   :  { %952 = vmatpush.bf16.msra.mxu2 %v1363_v6  ;;  %v1415_v6 = vor.u32 %v1649_v0, %v1412_v1  ;;  %v1364_v41 = vld [vmem:[#allocation5 + $0x278] sm:$0xf0]  ;;  %v1669_v42 = vld [vmem:[#allocation5 + $0x36c] sm:$0xf]  ;;  %v1239_v45 = vor.u32 %v1605_v37, %v1236_v39 }
  0x61   :  { %965 = vmatpush.bf16.msra.mxu3 %v1491_v12  ;;  %v1543_v12 = vor.u32 %v1681_v2, %v1540_v3  ;;  %v1492_v43 = vld [vmem:[#allocation5 + $0x378] sm:$0xf0]  ;;  %v1601_v49 = vld [vmem:[#allocation5 + $0x14c] sm:$0xf] }
  0x62   :  { %927 = vmatpush.bf16.msra.mxu0 %v1091_v19  ;;  %v1143_v19 = vor.u32 %v1581_v7, %v1140_v10  ;;  %v1092_v48 = vld [vmem:[#allocation5 + $0x58] sm:$0xf0]  ;;  %v1495_v50 = vor.u32 %v1669_v42, %v1492_v43  ;;  %v1665_v54 = vld [vmem:[#allocation5 + $0x34c] sm:$0xf] }
  0x63   :  { %940 = vmatpush.bf16.msra.mxu1 %v1219_v20  ;;  %v1271_v20 = vor.u32 %v1613_v11, %v1268_v13  ;;  %v1348_v53 = vld [vmem:[#allocation5 + $0x258] sm:$0xf0]  ;;  %v1565_v59 = vld [vmem:[#allocation5 + $0x2c] sm:$0xf] }
  0x64   :  { %953 = vmatpush.bf16.msra.mxu2 %v1347_v21  ;;  %v1399_v21 = vor.u32 %v1645_v14, %v1396_v15  ;;  %v1076_v60 = vld [vmem:[#allocation5 + $0x38] sm:$0xf0]  ;;  %v1597_v61 = vld [vmem:[#allocation5 + $0x12c] sm:$0xf] }
  0x65   :  { %966 = vmatpush.bf16.msra.mxu3 %v1475_v26  ;;  %v1527_v26 = vor.u32 %v1677_v16, %v1524_v17  ;;  %v1204_v63 = vld [vmem:[#allocation5 + $0x138] sm:$0xf0]  ;;  %v1629_v0 = vld [vmem:[#allocation5 + $0x22c] sm:$0xf] }
  0x66   :  { %928 = vmatpush.bf16.msra.mxu0 %v1075_v32  ;;  %v1127_v32 = vor.u32 %v1577_v22, %v1124_v23  ;;  %v1332_v1 = vld [vmem:[#allocation5 + $0x238] sm:$0xf0]  ;;  %v1661_v2 = vld [vmem:[#allocation5 + $0x32c] sm:$0xf] }
  0x67   :  { %941 = vmatpush.bf16.msra.mxu1 %v1203_v35  ;;  %v1573_v35 = vld [vmem:[#allocation5 + $0x6c] sm:$0xf]  ;;  %v1460_v3 = vld [vmem:[#allocation5 + $0x338] sm:$0xf0] }
  0x68   :  { %954 = vmatpush.bf16.msra.mxu2 %v1331_v36  ;;  %v1108_v36 = vld [vmem:[#allocation5 + $0x78] sm:$0xf0]  ;;  %v1561_v7 = vld [vmem:[#allocation5 + $0xc] sm:$0xf] }
  0x69   :  { %967 = vmatpush.bf16.msra.mxu3 %v1459_v40  ;;  %v1637_v40 = vld [vmem:[#allocation5 + $0x26c] sm:$0xf]  ;;  %v1111_v44 = vor.u32 %v1573_v35, %v1108_v36  ;;  %v1060_v10 = vld [vmem:[#allocation5 + $0x18] sm:$0xf0] }
  0x6a   :  { %929 = vmatpush.bf16.msra.mxu0 %v1059_v47  ;;  %v1367_v46 = vor.u32 %v1637_v40, %v1364_v41  ;;  %v1569_v47 = vld [vmem:[#allocation5 + $0x4c] sm:$0xf]  ;;  %v1188_v13 = vld [vmem:[#allocation5 + $0x118] sm:$0xf0] }
  0x6b   :  { %942 = vmatpush.bf16.msra.mxu1 %v1187_v51  ;;  %v1220_v51 = vld [vmem:[#allocation5 + $0x158] sm:$0xf0]  ;;  %v1593_v11 = vld [vmem:[#allocation5 + $0x10c] sm:$0xf] }
  0x6c   :  { %955 = vmatpush.bf16.msra.mxu2 %v1315_v52  ;;  %v1633_v52 = vld [vmem:[#allocation5 + $0x24c] sm:$0xf]  ;;  %v1316_v15 = vld [vmem:[#allocation5 + $0x218] sm:$0xf0] }
  0x6d   :  { %968 = vmatpush.bf16.msra.mxu3 %v1443_v55  ;;  %930 = vmatmul.bf16.vlgmr.msra.gmra.mxu0 %v1803_v18  ;;  %v1476_v55 = vld [vmem:[#allocation5 + $0x358] sm:$0xf0]  ;;  %v1625_v14 = vld [vmem:[#allocation5 + $0x20c] sm:$0xf] }
  0x6e   :  { %974 = vmatpush.bf16.msrb.mxu0 %v1175_v56  ;;  %943 = vmatmul.bf16.vlgmr.msra.gmra.mxu1 %v1805_v25  ;;  %v1095_v56 = vor.u32 %v1569_v47, %v1092_v48  ;;  %v1657_v16 = vld [vmem:[#allocation5 + $0x30c] sm:$0xf]  ;;  %v1444_v17 = vld [vmem:[#allocation5 + $0x318] sm:$0xf0] }
  0x6f   :  { %987 = vmatpush.bf16.msrb.mxu1 %v1303_v57  ;;  %956 = vmatmul.bf16.vlgmr.msra.gmra.mxu2 %v1797_v8  ;;  %v1223_v57 = vor.u32 %v1601_v49, %v1220_v51  ;;  %v1447_v22 = vor.u32 %v1657_v16, %v1444_v17 }
  0x70   :  { %1000 = vmatpush.bf16.msrb.mxu2 %v1431_v58  ;;  %969 = vmatmul.bf16.vlgmr.msra.gmra.mxu3 %v1799_v9  ;;  %v1351_v58 = vor.u32 %v1633_v52, %v1348_v53 }
  0x71   :  { %1013 = vmatpush.bf16.msrb.mxu3 %v1559_v62  ;;  %v1479_v62 = vor.u32 %v1665_v54, %v1476_v55 }
  0x72   :  { %975 = vmatpush.bf16.msrb.mxu0 %v1159_v4  ;;  %v1079_v4 = vor.u32 %v1565_v59, %v1076_v60 }
  0x73   :  { %988 = vmatpush.bf16.msrb.mxu1 %v1287_v5  ;;  %v1207_v5 = vor.u32 %v1597_v61, %v1204_v63 }
  0x74   :  { %1001 = vmatpush.bf16.msrb.mxu2 %v1415_v6  ;;  %v1335_v6 = vor.u32 %v1629_v0, %v1332_v1 }
  0x75   :  { %1014 = vmatpush.bf16.msrb.mxu3 %v1543_v12  ;;  %v1463_v12 = vor.u32 %v1661_v2, %v1460_v3 }
  0x76   :  { %976 = vmatpush.bf16.msrb.mxu0 %v1143_v19  ;;  %v1063_v19 = vor.u32 %v1561_v7, %v1060_v10 }
  0x77   :  { %989 = vmatpush.bf16.msrb.mxu1 %v1271_v20  ;;  %v1191_v20 = vor.u32 %v1593_v11, %v1188_v13 }
  0x78   :  { %1002 = vmatpush.bf16.msrb.mxu2 %v1399_v21  ;;  %v1319_v21 = vor.u32 %v1625_v14, %v1316_v15 }
  0x79   :  { %1015 = vmatpush.bf16.msrb.mxu3 %v1527_v26 }
  0x7a   :  { %977 = vmatpush.bf16.msrb.mxu0 %v1127_v32 }
  0x7b   :  { %990 = vmatpush.bf16.msrb.mxu1 %v1255_v33 }
  0x7c   :  { %1003 = vmatpush.bf16.msrb.mxu2 %v1383_v34 }
  0x7d   :  { %1016 = vmatpush.bf16.msrb.mxu3 %v1511_v38 }
  0x7e   :  { %978 = vmatpush.bf16.msrb.mxu0 %v1111_v44 }
  0x7f   :  { %991 = vmatpush.bf16.msrb.mxu1 %v1239_v45 }
  0x80   :  { %1004 = vmatpush.bf16.msrb.mxu2 %v1367_v46 }
  0x81   :  { %1017 = vmatpush.bf16.msrb.mxu3 %v1495_v50 }
  0x82   :  { %979 = vmatpush.bf16.msrb.mxu0 %v1095_v56 }
  0x83   :  { %992 = vmatpush.bf16.msrb.mxu1 %v1223_v57 }
  0x84   :  { %1005 = vmatpush.bf16.msrb.mxu2 %v1351_v58 }
  0x85   :  { %1018 = vmatpush.bf16.msrb.mxu3 %v1479_v62 }
  0x86   :  { %980 = vmatpush.bf16.msrb.mxu0 %v1079_v4 }
  0x87   :  { %993 = vmatpush.bf16.msrb.mxu1 %v1207_v5 }
  0x88   :  { %1006 = vmatpush.bf16.msrb.mxu2 %v1335_v6 }
  0x89   :  { %1019 = vmatpush.bf16.msrb.mxu3 %v1463_v12 }
  0x8a   :  { %981 = vmatpush.bf16.msrb.mxu0 %v1063_v19 }
  0x8b   :  { %994 = vmatpush.bf16.msrb.mxu1 %v1191_v20 }
  0x8c   :  { %1007 = vmatpush.bf16.msrb.mxu2 %v1319_v21 }
  0x8d   :  { %1020 = vmatpush.bf16.msrb.mxu3 %v1447_v22  ;;  %982 = vmatmul.bf16.vlgmr.msrb.gmra.mxu0 %v1803_v18 }
  0x8e   :  { %995 = vmatmul.bf16.vlgmr.msrb.gmra.mxu1 %v1805_v25 }
  0x8f   :  { %1008 = vmatmul.bf16.vlgmr.msrb.gmra.mxu2 %v1797_v8 }
  0x90   :  { %1021 = vmatmul.bf16.vlgmr.msrb.gmra.mxu3 %v1799_v9 }
  0xaf   :  { %v840_v24 = vpop.f32.mrf.mxu1 }
  0xb0   :  { %v827_v23 = vpop.f32.mrf.mxu0 }
  0xb1   :  { %v841_v26 = vadd.f32 %v840_v24, %v827_v23 }
  0xb3   :  { %v866_v28 = vpop.f32.mrf.mxu3 }
  0xb4   :  { %v853_v27 = vpop.f32.mrf.mxu2 }
  0xb5   :  { %v854_v29 = vadd.f32 %v853_v27, %v841_v26 }
  0xb7   :  { %v867_v30 = vadd.f32 %v866_v28, %v854_v29  ;;  %v842_v32 = vpop.f32.mrf.mxu1 }
  0xb8   :  { %v829_v31 = vpop.f32.mrf.mxu0 }
  0xb9   :  { %1026 = vst [vmem:[#allocation7] sm:$0xff] %v867_v30 }
  0xbb   :  { %v868_v34 = vpop.f32.mrf.mxu3 }
  0xbc   :  { %v855_v33 = vpop.f32.mrf.mxu2 }
  0xca   :  { %v879_v35 = vpop.f32.mrf.mxu0 }
  0xcb   :  { %v892_v18 = vpop.f32.mrf.mxu1 }
  0xcc   :  { %v893_v36 = vadd.f32 %v892_v18, %v879_v35 }
  0xd2   :  { %v905_v25 = vpop.f32.mrf.mxu2  ;;  %v881_v9 = vpop.f32.mrf.mxu0 }
  0xd3   :  { %v906_v37 = vadd.f32 %v905_v25, %v893_v36  ;;  %v918_v8 = vpop.f32.mrf.mxu3  ;;  %v894_v39 = vpop.f32.mrf.mxu1 }
  0xd5   :  { %v919_v38 = vadd.f32 %v918_v8, %v906_v37 }
  0xd7   :  { %1027 = vst [vmem:[#allocation7 + $0x8] sm:$0xff] %v919_v38 }
  0xda   :  { %v907_v40 = vpop.f32.mrf.mxu2 }
  0xdb   :  { %v920_v41 = vpop.f32.mrf.mxu3 }
  0xea   :  { %v931_v42 = vpop.f32.mrf.mxu0 }
  0xeb   :  { %v944_v43 = vpop.f32.mrf.mxu1 }
  0xec   :  { %v945_v44 = vadd.f32 %v944_v43, %v931_v42 }
  0xf2   :  { %v957_v45 = vpop.f32.mrf.mxu2  ;;  %v933_v49 = vpop.f32.mrf.mxu0 }
  0xf3   :  { %v958_v46 = vadd.f32 %v957_v45, %v945_v44  ;;  %v970_v47 = vpop.f32.mrf.mxu3  ;;  %v946_v50 = vpop.f32.mrf.mxu1 }
  0xf5   :  { %v971_v48 = vadd.f32 %v970_v47, %v958_v46 }
  0xf7   :  { %1028 = vst [vmem:[#allocation7 + $0x10] sm:$0xff] %v971_v48 }
  0xfa   :  { %v959_v51 = vpop.f32.mrf.mxu2 }
  0xfb   :  { %v972_v52 = vpop.f32.mrf.mxu3 }
 0x10a   :  { %v983_v53 = vpop.f32.mrf.mxu0 }
 0x10b   :  { %v996_v54 = vpop.f32.mrf.mxu1 }
 0x10c   :  { %v997_v55 = vadd.f32 %v996_v54, %v983_v53 }
 0x112   :  { %v1009_v56 = vpop.f32.mrf.mxu2  ;;  %v985_v59 = vpop.f32.mrf.mxu0 }
 0x113   :  { %v1010_v57 = vadd.f32 %v1009_v56, %v997_v55  ;;  %v1022_v58 = vpop.f32.mrf.mxu3  ;;  %v998_v60 = vpop.f32.mrf.mxu1 }
 0x115   :  { %v1023_v61 = vadd.f32 %v1022_v58, %v1010_v57 }
 0x117   :  { %1029 = vst [vmem:[#allocation7 + $0x18] sm:$0xff] %v1023_v61 }
 0x118   :  { %1040 = dma.vmem_to_hbm [thread:$0]  %s1036_s1, 512, %s1038_s23, [#allocation4]  }
 0x11a   :  { %v1011_v62 = vpop.f32.mrf.mxu2 }
 0x11b   :  { %v1024_v63 = vpop.f32.mrf.mxu3 }
 0x11c   :  { %1769 = dma.done.wait [#allocation4], 512  }
 0x11d   :  { %1770 = vsyncadd [#allocation4], 4294966784 }
 0x11e   :  { %1045 = vsyncpa [#allocation3], 1 }
 0x11f   :  { %1046 = vsyncpa [#allocation6], 1 }
 0x120   :  { %1047 = vsyncpa [#allocation4], 1 }

</bundles_post_ra>
